<compile_context>
chip_gen: v6e
topology: v6e:2x2x1
jax: 0.10.0
libtpu: 0.0.40
codegen_flags: <defaults>
</compile_context>

<pallas_src>
import functools

import jax
import jax.numpy as jnp
from jax import lax
from jax.experimental import pallas as pl
from jax.experimental.pallas import tpu as pltpu

_LANE = 128
_MIB = 1024 * 1024


# ---------------------------------------------------------------------------
# helpers
# ---------------------------------------------------------------------------
def _vmem_capacity_bytes():
    try:
        return int(pltpu.get_tpu_info().vmem_capacity_bytes)
    except Exception:
        return 64 * _MIB  # conservative: v7x per-TensorCore VMEM


def _round_up(x, m):
    return (x + m - 1) // m * m


def _sublane(dtype):
    # f32 -> 8, bf16 -> 16, int8/fp8 -> 32 rows per packed vreg.
    return max(8, 32 // jnp.dtype(dtype).itemsize)


def _vmem_limit(needed_bytes, vmem_cap):
    return int(min(0.9 * vmem_cap, max(needed_bytes, 32 * _MIB)))


def _pad_features(w):
    """Zero-pad the feature (last) dim to a multiple of 128 (lane-dense)."""
    pad = (-w.shape[1]) % _LANE
    if pad:
        w = jnp.pad(w, ((0, 0), (0, pad)))
    return w


def _pad_rows(w, n_pad):
    """Zero-pad the class (first) dim up to n_pad rows."""
    pad = n_pad - w.shape[0]
    if pad:
        w = jnp.pad(w, ((0, pad), (0, 0)))
    return w


# ---------------------------------------------------------------------------
# kernels
# ---------------------------------------------------------------------------
def _cross_centered_kernel(true_n, wt_ref, wc_ref, out_ref):
    """Single-block f32 path: HSIC = ||(H W_t)^T W_c||_F^2 / (nt2 * nc2)."""
    wt = wt_ref[...].astype(jnp.float32)                    # (n_pad, d_t)
    wc = wc_ref[...].astype(jnp.float32)                    # (n_pad, d_c)
    nt2 = jnp.sum(wt * wt)
    nc2 = jnp.sum(wc * wc)
    # Center W_t over the TRUE class count.  Padded (zero) rows of W_t turn
    # into -mean, but the matching rows of W_c are zero, so M is unchanged.
    mean_t = jnp.sum(wt, axis=0, keepdims=True) * (1.0 / true_n)   # (1, d_t)
    wt_c = wt - mean_t
    m = lax.dot_general(wt_c, wc, (((0,), (0,)), ((), ())),
                        preferred_element_type=jnp.float32)        # (d_t, d_c)
    # Degenerate all-zero inputs give 0/0 == NaN, matching the reference.
    out_ref[0] = jnp.sum(m * m) / (nt2 * nc2)


def _cross_grid_kernel(true_n, wt_ref, wc_ref, out_ref,
                       m_acc, u_acc, v_acc, sqt_acc, sqc_acc):
    """Class-axis-gridded cross form with f32 VMEM accumulators.

    Accumulates M = W_t^T W_c, column sums u/v and per-feature squared sums,
    then finalizes with the expanded identity
      ||M - (1/n) u^T v||_F^2 = ||M||^2 - (2/n)(uM).v + (1/n^2)||u||^2||v||^2.
    """
    k = pl.program_id(0)

    @pl.when(k == 0)
    def _():
        m_acc[...] = jnp.zeros_like(m_acc)
        u_acc[...] = jnp.zeros_like(u_acc)
        v_acc[...] = jnp.zeros_like(v_acc)
        sqt_acc[...] = jnp.zeros_like(sqt_acc)
        sqc_acc[...] = jnp.zeros_like(sqc_acc)

    wt = wt_ref[...]                                         # (cn, d_t), native dtype -> MXU
    wc = wc_ref[...]                                         # (cn, d_c)
    m_acc[...] += lax.dot_general(wt, wc, (((0,), (0,)), ((), ())),
                                  preferred_element_type=jnp.float32)
    wt32 = wt.astype(jnp.float32)
    wc32 = wc.astype(jnp.float32)
    u_acc[...] += jnp.sum(wt32, axis=0, keepdims=True)
    v_acc[...] += jnp.sum(wc32, axis=0, keepdims=True)
    sqt_acc[...] += jnp.sum(wt32 * wt32, axis=0, keepdims=True)
    sqc_acc[...] += jnp.sum(wc32 * wc32, axis=0, keepdims=True)

    @pl.when(k == pl.num_programs(0) - 1)
    def _():
        m = m_acc[...]
        u = u_acc[...]                                       # (1, d_t)
        v = v_acc[...]                                       # (1, d_c)
        u_m = jnp.dot(u, m, preferred_element_type=jnp.float32)   # (1, d_c)
        inv_n = 1.0 / true_n
        hsic_raw = (jnp.sum(m * m)
                    - 2.0 * inv_n * jnp.sum(u_m * v)
                    + inv_n * inv_n * jnp.sum(u * u) * jnp.sum(v * v))
        nt2 = jnp.sum(sqt_acc[...])
        nc2 = jnp.sum(sqc_acc[...])
        out_ref[0] = hsic_raw / (nt2 * nc2)


def _gram_kernel(true_n, wt_ref, wc_ref, out_ref):
    """Fallback for (d_t, d_c) cross tiles too large for VMEM (single block).

    trace(H K_t H K_c) = sum(K_t*K_c) - (2/n)<r_t, r_c> + S_t S_c / n^2
    with r_t = K_t @ 1 = W_t (W_t^T 1) (MXU matvec) and S_t = ||W_t^T 1||^2,
    so no iota-masked diagonals and no (n,n) lane reductions are needed.
    """
    wt = wt_ref[...]
    wc = wc_ref[...]
    contract_last = (((1,), (1,)), ((), ()))
    k_t = lax.dot_general(wt, wt, contract_last,
                          preferred_element_type=jnp.float32)      # (n, n)
    k_c = lax.dot_general(wc, wc, contract_last,
                          preferred_element_type=jnp.float32)      # (n, n)
    wt32 = wt.astype(jnp.float32)
    wc32 = wc.astype(jnp.float32)
    nt2 = jnp.sum(wt32 * wt32)
    nc2 = jnp.sum(wc32 * wc32)
    u_t = jnp.sum(wt32, axis=0, keepdims=True)                     # (1, d_t)
    u_c = jnp.sum(wc32, axis=0, keepdims=True)                     # (1, d_c)
    r_t = lax.dot_general(wt32, u_t, contract_last,
                          preferred_element_type=jnp.float32)      # (n, 1)
    r_c = lax.dot_general(wc32, u_c, contract_last,
                          preferred_element_type=jnp.float32)      # (n, 1)
    s_t = jnp.sum(u_t * u_t)
    s_c = jnp.sum(u_c * u_c)
    inv_n = 1.0 / true_n
    hsic_raw = (jnp.sum(k_t * k_c)
                - 2.0 * inv_n * jnp.sum(r_t * r_c)
                + inv_n * inv_n * s_t * s_c)
    out_ref[0] = hsic_raw / (nt2 * nc2)


# ---------------------------------------------------------------------------
# pallas_call wrappers
# ---------------------------------------------------------------------------
def _call_single(kernel, wt, wc, vmem_limit):
    return pl.pallas_call(
        kernel,
        out_shape=jax.ShapeDtypeStruct((1,), jnp.float32),
        in_specs=[pl.BlockSpec(wt.shape, lambda: (0, 0)),
                  pl.BlockSpec(wc.shape, lambda: (0, 0))],
        out_specs=pl.BlockSpec(memory_space=pltpu.MemorySpace.SMEM),
        compiler_params=pltpu.CompilerParams(vmem_limit_bytes=vmem_limit),
    )(wt, wc)


def hsic_loss(w_t, w_clip, *, chunk_rows=None, use_gram=None):
    """Pallas-backed HSIC loss. w_t: (n_cls, d_t), w_clip: (n_cls, d_c)."""
    assert w_t.shape[0] == w_clip.shape[0], "class dims must match"
    n = w_t.shape[0]
    itemsize = max(jnp.dtype(w_t.dtype).itemsize, jnp.dtype(w_clip.dtype).itemsize)
    sub = max(_sublane(w_t.dtype), _sublane(w_clip.dtype))

    # Zero feature columns / class rows are exactly neutral for this loss.
    w_t = _pad_features(w_t)
    w_clip = _pad_features(w_clip)
    d_t = w_t.shape[1]
    d_c = w_clip.shape[1]

    vmem_cap = _vmem_capacity_bytes()
    cross_tile_bytes = 4 * d_t * d_c
    if use_gram is None:
        # Cross form strictly dominates (fewer MACs, no (n,n) temporaries)
        # whenever its f32 (d_t, d_c) accumulator fits the VMEM budget.
        use_gram = cross_tile_bytes > vmem_cap // 4

    is_f32 = (w_t.dtype == jnp.float32) and (w_clip.dtype == jnp.float32)
    true_n = float(n)

    if use_gram:
        n_pad = _round_up(n, sub)
        wt_p = _pad_rows(w_t, n_pad)
        wc_p = _pad_rows(w_clip, n_pad)
        gram_bytes = 2 * 4 * n_pad * n_pad
        needed = 2 * n_pad * (d_t + d_c) * itemsize + 2 * gram_bytes + 8 * _MIB
        # TODO(synk): grid the Gram fallback over the feature axis with (n,n)
        # f32 VMEM accumulators when both n and d are production-scale.
        out = _call_single(functools.partial(_gram_kernel, true_n),
                           wt_p, wc_p, _vmem_limit(needed, vmem_cap))
        return out[0]

    # ----- cross form -----
    row_bytes = (d_t + d_c) * itemsize
    if chunk_rows is None:
        target = 4 * _MIB                           # 2-8 MiB per pipelined chunk
        cn = max(sub, (target // row_bytes) // sub * sub)
        if cn >= 256:                               # MXU-friendly contraction chunk (v6e/v7x)
            cn = cn // 256 * 256
    else:
        cn = max(sub, _round_up(chunk_rows, sub))

    n_sub = _round_up(n, sub)
    if n_sub <= cn and is_f32:
        # Single block: explicitly centered form (one MXU pass, no
        # cancellation-prone three-term sum).
        wt_p = _pad_rows(w_t, n_sub)
        wc_p = _pad_rows(w_clip, n_sub)
        needed = 2 * n_sub * (d_t + d_c) * itemsize + 2 * cross_tile_bytes + 8 * _MIB
        out = _call_single(functools.partial(_cross_centered_kernel, true_n),
                           wt_p, wc_p, _vmem_limit(needed, vmem_cap))
        return out[0]

    # Gridded over the class (contraction) axis with f32 VMEM accumulators.
    cn = min(cn, n_sub)
    n_pad = _round_up(n, cn)
    wt_p = _pad_rows(w_t, n_pad)
    wc_p = _pad_rows(w_clip, n_pad)
    num_chunks = n_pad // cn

    scratch_bytes = 4 * (d_t * d_c + 3 * (d_t + d_c))
    chunk_bytes = cn * (d_t + d_c) * itemsize
    needed = 2 * chunk_bytes + scratch_bytes + 8 * _MIB    # 2 bufs per pipelined input

    grid_spec = pltpu.PrefetchScalarGridSpec(
        num_scalar_prefetch=0,
        grid=(num_chunks,),
        in_specs=[pl.BlockSpec((cn, d_t), lambda k: (k, 0)),
                  pl.BlockSpec((cn, d_c), lambda k: (k, 0))],
        out_specs=pl.BlockSpec(memory_space=pltpu.MemorySpace.SMEM),
        scratch_shapes=[pltpu.VMEM((d_t, d_c), jnp.float32),   # M accumulator
                        pltpu.VMEM((1, d_t), jnp.float32),     # u = 1^T W_t
                        pltpu.VMEM((1, d_c), jnp.float32),     # v = 1^T W_c
                        pltpu.VMEM((1, d_t), jnp.float32),     # per-feature sum W_t^2
                        pltpu.VMEM((1, d_c), jnp.float32)])    # per-feature sum W_c^2
    out = pl.pallas_call(
        functools.partial(_cross_grid_kernel, true_n),
        out_shape=jax.ShapeDtypeStruct((1,), jnp.float32),
        grid_spec=grid_spec,
        compiler_params=pltpu.CompilerParams(
            dimension_semantics=("arbitrary",),
            vmem_limit_bytes=_vmem_limit(needed, vmem_cap)),
    )(wt_p, wc_p)
    # TODO(synk): for v7x megacore, add a "parallel" grid axis over d_c tiles
    # (the Frobenius sum decomposes column-wise) and combine the per-tile
    # partial sums in the wrapper so both TensorCores are used.
    return out[0]


# ---------------------------------------------------------------------------
# pure-JAX reference mirroring the PyTorch module
# ---------------------------------------------------------------------------
def hsic_loss_ref(w_t, w_clip):
    w_t = w_t / jnp.linalg.norm(w_t)
    w_clip = w_clip / jnp.linalg.norm(w_clip)
    n = w_t.shape[0]
    H = jnp.eye(n, dtype=w_t.dtype) - jnp.ones((n, n), dtype=w_t.dtype) / n
    K_t = w_t @ w_t.T
    K_c = w_clip @ w_clip.T
    return jnp.trace(H @ (K_t @ (H @ K_c)))


if __name__ == "__main__":
    key = jax.random.PRNGKey(0)
    keys = jax.random.split(key, 8)

    def check(name, out, ref, rtol, atol):
        assert jnp.allclose(out, ref, rtol=rtol, atol=atol), (name, out, ref)

    # 1) Single-block centered f32 path; n_cls=7 exercises class-row padding
    #    (true n_cls passed to the kernel) and feature padding (96 -> 128).
    W_t = jax.random.normal(keys[0], (7, 96), dtype=jnp.float32)
    W_c = jax.random.normal(keys[1], (7, 64), dtype=jnp.float32)
    out = jax.block_until_ready(hsic_loss(W_t, W_c))
    check("centered-small", out, hsic_loss_ref(W_t, W_c), 1e-4, 1e-6)

    # 2) Larger class count; cost-based heuristic now keeps the cross form
    #    (the previous version wrongly chose the Gram form here).
    W_t2 = jax.random.normal(keys[2], (256, 64), dtype=jnp.float32)
    W_c2 = jax.random.normal(keys[3], (256, 32), dtype=jnp.float32)
    ref2 = hsic_loss_ref(W_t2, W_c2)
    out2 = jax.block_until_ready(hsic_loss(W_t2, W_c2))
    check("centered-256", out2, ref2, 1e-4, 1e-6)

    # 3) Gridded (class-axis-chunked) cross path with VMEM accumulators.
    W_t3 = jax.random.normal(keys[4], (1024, 256), dtype=jnp.float32)
    W_c3 = jax.random.normal(keys[5], (1024, 128), dtype=jnp.float32)
    out3 = jax.block_until_ready(hsic_loss(W_t3, W_c3, chunk_rows=256))
    check("gridded-f32", out3, hsic_loss_ref(W_t3, W_c3), 1e-3, 1e-6)

    # 4) bf16 inputs through the expanded (native-dtype MXU) gridded path.
    W_t4 = jax.random.normal(keys[6], (64, 128), dtype=jnp.float32).astype(jnp.bfloat16)
    W_c4 = jax.random.normal(keys[7], (64, 64), dtype=jnp.float32).astype(jnp.bfloat16)
    out4 = jax.block_until_ready(hsic_loss(W_t4, W_c4, chunk_rows=32))
    ref4 = hsic_loss_ref(W_t4.astype(jnp.float32), W_c4.astype(jnp.float32))
    check("gridded-bf16", out4, ref4, 5e-2, 1e-4)

    # 5) Gram fallback kernel (forced; normally used only when the (d_t, d_c)
    #    cross tile would not fit VMEM).
    out5 = jax.block_until_ready(hsic_loss(W_t2, W_c2, use_gram=True))
    check("gram-fallback", out5, ref2, 1e-4, 1e-6)

    print("KERNEL_OK")
</pallas_src>

<mosaic_0001>
module attributes {stable_mosaic.version = 11 : i64} {
  func.func @_cross_centered_kernel(%arg0: memref<8x128xf32, #tpu.memory_space<vmem>>, %arg1: memref<8x128xf32, #tpu.memory_space<vmem>>, %arg2: memref<1xf32, #tpu.memory_space<smem>>) attributes {dimension_semantics = [], scalar_prefetch = 0 : i64, scratch_operands = 0 : i64, tpu.core_type = #tpu.core_type<tc>} {
    %c0 = arith.constant 0 : index
    %c0_0 = arith.constant 0 : index
    %0 = vector.load %arg0[%c0, %c0_0] : memref<8x128xf32, #tpu.memory_space<vmem>>, vector<8x128xf32>
    %c0_1 = arith.constant 0 : index
    %c0_2 = arith.constant 0 : index
    %1 = vector.load %arg1[%c0_1, %c0_2] : memref<8x128xf32, #tpu.memory_space<vmem>>, vector<8x128xf32>
    %2 = arith.mulf %0, %0 : vector<8x128xf32>
    %3 = vector.shape_cast %2 : vector<8x128xf32> to vector<1x8x128xf32>
    %cst = arith.constant dense<0.000000e+00> : vector<1xf32>
    %4 = vector.multi_reduction <add>, %3, %cst [1, 2] : vector<1x8x128xf32> to vector<1xf32>
    %5 = vector.shape_cast %4 : vector<1xf32> to vector<1x1x1xf32>
    %6 = vector.extract %5[0, 0, 0] : f32 from vector<1x1x1xf32>
    %7 = arith.mulf %1, %1 : vector<8x128xf32>
    %8 = vector.shape_cast %7 : vector<8x128xf32> to vector<1x8x128xf32>
    %cst_3 = arith.constant dense<0.000000e+00> : vector<1xf32>
    %9 = vector.multi_reduction <add>, %8, %cst_3 [1, 2] : vector<1x8x128xf32> to vector<1xf32>
    %10 = vector.shape_cast %9 : vector<1xf32> to vector<1x1x1xf32>
    %11 = vector.extract %10[0, 0, 0] : f32 from vector<1x1x1xf32>
    %cst_4 = arith.constant dense<0.000000e+00> : vector<128xf32>
    %12 = vector.multi_reduction <add>, %0, %cst_4 [0] : vector<8x128xf32> to vector<128xf32>
    %13 = vector.shape_cast %12 : vector<128xf32> to vector<1x128xf32>
    %cst_5 = arith.constant 0.142857149 : f32
    %14 = vector.broadcast %cst_5 : f32 to vector<1x128xf32>
    %15 = arith.mulf %13, %14 : vector<1x128xf32>
    %16 = vector.broadcast %15 : vector<1x128xf32> to vector<8x128xf32>
    %17 = arith.subf %0, %16 : vector<8x128xf32>
    %cst_6 = arith.constant dense<0.000000e+00> : vector<128x128xf32>
    %18 = tpu.matmul %17, %1, %cst_6 {dimension_numbers = #tpu.dot_dimension_numbers<[0], [0], [1], [1], [0, 1, 1, 1], [], []>} : vector<8x128xf32>, vector<8x128xf32>, vector<128x128xf32> -> vector<128x128xf32>
    %19 = arith.mulf %18, %18 : vector<128x128xf32>
    %20 = vector.shape_cast %19 : vector<128x128xf32> to vector<1x128x128xf32>
    %cst_7 = arith.constant dense<0.000000e+00> : vector<1xf32>
    %21 = vector.multi_reduction <add>, %20, %cst_7 [1, 2] : vector<1x128x128xf32> to vector<1xf32>
    %22 = vector.shape_cast %21 : vector<1xf32> to vector<1x1x1xf32>
    %23 = vector.extract %22[0, 0, 0] : f32 from vector<1x1x1xf32>
    %24 = arith.mulf %6, %11 : f32
    %25 = arith.divf %23, %24 : f32
    %c0_8 = arith.constant 0 : index
    %26 = memref.load %arg2[%c0_8] : memref<1xf32, #tpu.memory_space<smem>>
    memref.store %25, %arg2[%c0_8] : memref<1xf32, #tpu.memory_space<smem>>
    return
  }
}

</mosaic_0001>

<bundles_post_ra>
// kernel: tpu_custom_call.1
= control target key start
LH: loop header
LB: loop body
LE: loop exit
PB: predicated region body
PF: predicated region fallthrough
CT: control target
= control target key end

     0   :  { %7 = vsyncpa [#allocation3], 0  ;;  %s526_s0 = inlined_call_operand.hbm [shape: f32[8,128], index: 0, kind: input, shape index: {}]   ;;  %s527_s1 = inlined_call_operand.hbm [shape: f32[8,128], index: 1, kind: input, shape index: {}]   ;;  %s528_s2 = inlined_call_operand.hbm [shape: f32[1], index: 2, kind: output, shape index: {}]  }
   0x1   :  { %8 = vsyncpa [#allocation6], 0 }
   0x2   :  { %9 = vsyncpa [#allocation4], 0  ;;  %s483_s9 = smov [#allocation2]   ;;  %s484_s11 = smov [#allocation5]  }
   0x3   :  { %s16_s10 = sshll.u32 %s483_s9, 4  ;;  %s26_s12 = sshll.u32 %s484_s11, 4  ;;  %s17_s10 = int_to_ptr.vmem [resolvable:$true] %s16_s10  ;;  %s27_s12 = int_to_ptr.vmem [resolvable:$true] %s26_s12 }
   0x4   :  { %s437_s13 = scalar_lea.vmem %s17_s10, 128  ;;  %p442_p1 = scmp.lt.s32.totalorder %s17_s10, %s17_s10 }
   0x5   :  { %p438_p0 = scmp.ne.s32.totalorder %s17_s10, %s437_s13  ;;  %p443_p2 = scmp.lt.s32.totalorder %s437_s13, %s437_s13 }
   0x7   :  { %p444_p3 = por %p443_p2, %p442_p1 }
   0x9   :  { %p445_p4 = pnand %p444_p3, %p438_p0 }
   0xb   :  { %448 = shalt.err (!%p445_p4)
}
   0xc   :  { %19 = dma.hbm_to_vmem [thread:$0]  %s526_s0, 128, %s17_s10, [#allocation3]  }
   0xd   :  { %s457_s16 = scalar_lea.vmem %s27_s12, 128  ;;  %p462_p6 = scmp.lt.s32.totalorder %s27_s12, %s27_s12 }
   0xe   :  { %p458_p5 = scmp.ne.s32.totalorder %s27_s12, %s457_s16  ;;  %p463_p7 = scmp.lt.s32.totalorder %s457_s16, %s457_s16 }
  0x10   :  { %p464_p8 = por %p463_p7, %p462_p6 }
  0x12   :  { %p465_p9 = pnand %p464_p8, %p458_p5 }
  0x14   :  { %468 = shalt.err (!%p465_p9)
}
  0x15   :  { %29 = dma.hbm_to_vmem [thread:$0]  %s527_s1, 128, %s27_s12, [#allocation6]  }
  0x16   :  { %477 = dma.done.wait [#allocation3], 128  }
  0x17   :  { %478 = vsyncadd [#allocation3], 4294967168 }
  0x18   :  { %479 = dma.done.wait [#allocation6], 128  }
  0x19   :  { %480 = vsyncadd [#allocation6], 4294967168  ;;  %v36_v0 = vld [vmem:[#allocation2] sm:$0xff]  ;;  %v37_v8 = vld [vmem:[#allocation5] sm:$0xff]  ;;  %vm98_vm0 = vcmask 64512   ;;  %s485_s23 = smov [#allocation7]  }
  0x1a   :  { %v58_v1 = vrot.slane %v36_v0, 4  ;;  %387 = vmatprep.subr.mxu0 %v37_v8  ;;  %413 = vmatprep.subr.mxu1 %v37_v8  ;;  %v48_v10 = vmul.f32 %v37_v8, %v37_v8  ;;  %v38_v11 = vmul.f32 %v36_v0, %v36_v0 }
  0x1b   :  { %388 = vmatpush3.msra.mxu0 %v37_v8  ;;  %414 = vmatpush3.msra.mxu1 %v37_v8 }
  0x1c   :  { %v59_v2 = vadd.f32 %v58_v1, %v36_v0  ;;  %49 = vadd.xlane.f32.xlu1 %v48_v10 }
  0x1e   :  { %v60_v3 = vrot.slane %v59_v2, 2 }
  0x20   :  { %v61_v4 = vadd.f32 %v60_v3, %v59_v2 }
  0x22   :  { %v62_v5 = vrot.slane %v61_v4, 1 }
  0x24   :  { %v63_v6 = vadd.f32 %v62_v5, %v61_v4 }
  0x26   :  { %v64_v7 = vmul.f32 0.14285715, %v63_v6 }
  0x28   :  { %v65_v9 = vsub.f32 %v36_v0, %v64_v7 }
  0x2a   :  { %66 = vxpose.xlu0.b32.start.end [1/1] (short) %v65_v9, 128 }
  0x93   :  { %39 = vadd.xlane.f32.xlu0 %v38_v11 }
  0xa5   :  { %v50_v28 = vpop.xlane.xlu1 %49 }
  0xa6   :  { %v82_v12 = vpop.trf.xlu0  ;;  %v51_v30 = vrot.slane %v50_v28, 4 }
  0xa7   :  { %389 = vmatprep.mubr.msk.f32.mxu0 %vm98_vm0, %v82_v12 }
  0xa8   :  { %v52_v32 = vadd.f32 %v51_v30, %v50_v28 }
  0xaa   :  { %v83_v13 = vpop.trf.xlu0  ;;  %v53_v34 = vrot.slane %v52_v32, 2 }
  0xab   :  { %390 = vmatmul.mubr.msk.f32.vlgmr.msra.gmra.mxu0 %vm98_vm0, %v83_v13 }
  0xac   :  { %v54_v37 = vadd.f32 %v53_v34, %v52_v32 }
  0xae   :  { %v84_v14 = vpop.trf.xlu0  ;;  %v55_v39 = vrot.slane %v54_v37, 1 }
  0xaf   :  { %392 = vmatprep.mubr.msk.f32.mxu0 %vm98_vm0, %v84_v14 }
  0xb0   :  { %v56_v41 = vadd.f32 %v55_v39, %v54_v37 }
  0xb2   :  { %v85_v15 = vpop.trf.xlu0 }
  0xb3   :  { %393 = vmatmul.mubr.msk.f32.gmra.mxu0 %vm98_vm0, %v85_v15 }
  0xb6   :  { %v86_v16 = vpop.trf.xlu0 }
  0xb7   :  { %395 = vmatprep.mubr.msk.f32.mxu0 %vm98_vm0, %v86_v16 }
  0xba   :  { %v87_v17 = vpop.trf.xlu0 }
  0xbb   :  { %396 = vmatmul.mubr.msk.f32.gmra.mxu0 %vm98_vm0, %v87_v17 }
  0xbe   :  { %v88_v18 = vpop.trf.xlu0 }
  0xbf   :  { %398 = vmatprep.mubr.msk.f32.mxu0 %vm98_vm0, %v88_v18 }
  0xc2   :  { %v89_v19 = vpop.trf.xlu0 }
  0xc3   :  { %399 = vmatmul.mubr.msk.f32.gmra.mxu0 %vm98_vm0, %v89_v19 }
  0xc6   :  { %v90_v20 = vpop.trf.xlu0 }
  0xc7   :  { %401 = vmatprep.mubr.msk.f32.mxu1 %vm98_vm0, %v90_v20 }
  0xca   :  { %v91_v21 = vpop.trf.xlu0 }
  0xcb   :  { %402 = vmatmul.mubr.msk.f32.vlgmr.msra.gmra.mxu1 %vm98_vm0, %v91_v21 }
  0xce   :  { %v92_v22 = vpop.trf.xlu0 }
  0xcf   :  { %404 = vmatprep.mubr.msk.f32.mxu1 %vm98_vm0, %v92_v22 }
  0xd2   :  { %v93_v23 = vpop.trf.xlu0 }
  0xd3   :  { %405 = vmatmul.mubr.msk.f32.gmra.mxu1 %vm98_vm0, %v93_v23 }
  0xd6   :  { %v94_v24 = vpop.trf.xlu0 }
  0xd7   :  { %407 = vmatprep.mubr.msk.f32.mxu1 %vm98_vm0, %v94_v24 }
  0xda   :  { %v95_v25 = vpop.trf.xlu0 }
  0xdb   :  { %408 = vmatmul.mubr.msk.f32.gmra.mxu1 %vm98_vm0, %v95_v25 }
  0xde   :  { %v96_v26 = vpop.trf.xlu0 }
  0xdf   :  { %410 = vmatprep.mubr.msk.f32.mxu1 %vm98_vm0, %v96_v26 }
  0xe2   :  { %v97_v27 = vpop.trf.xlu0 }
  0xe3   :  { %411 = vmatmul.mubr.msk.f32.gmra.mxu1 %vm98_vm0, %v97_v27 }
 0x11c   :  { %v40_v29 = vpop.xlane.xlu0 %39 }
 0x11d   :  { %v41_v31 = vrot.slane %v40_v29, 4 }
 0x11f   :  { %v42_v33 = vadd.f32 %v41_v31, %v40_v29 }
 0x121   :  { %v43_v35 = vrot.slane %v42_v33, 2 }
 0x123   :  { %v44_v36 = vadd.f32 %v43_v35, %v42_v33 }
 0x125   :  { %v45_v38 = vrot.slane %v44_v36, 1 }
 0x127   :  { %v46_v40 = vadd.f32 %v45_v38, %v44_v36 }
 0x129   :  { %415 = vpush %v46_v40 }
 0x12a   :  { %417 = vpush %v56_v41 }
 0x15a   :  { %s416_s0 = spop %415 }
 0x15b   :  { %s418_s1 = spop %417 }
 0x15c   :  { %s332_s19 = smul.f32 %s418_s1, %s416_s0 }
 0x15e   :  { %v333_v25 = vstv %s332_s19 }
 0x15f   :  { %427 = vrcp.f32 %v333_v25 }
 0x16b   :  { %v391_v42 = vpop.f32.mrf.mxu0 }
 0x16c   :  { %v293_v48 = vmul.f32 %v391_v42, %v391_v42  ;;  %v428_v33 = vpop.eup %427 }
 0x16d   :  { %v213_v43 = vpop.f32.mrf.mxu0 }
 0x16e   :  { %v292_v46 = vmul.f32 %v213_v43, %v213_v43 }
 0x170   :  { %v308_v50 = vadd.f32 %v293_v48, %v292_v46 }
 0x173   :  { %v394_v44 = vpop.f32.mrf.mxu0 }
 0x174   :  { %v295_v54 = vmul.f32 %v394_v44, %v394_v44 }
 0x175   :  { %v223_v45 = vpop.f32.mrf.mxu0 }
 0x176   :  { %v294_v49 = vmul.f32 %v223_v45, %v223_v45 }
 0x178   :  { %v309_v52 = vadd.f32 %v308_v50, %v294_v49 }
 0x17a   :  { %v310_v56 = vadd.f32 %v309_v52, %v295_v54 }
 0x17b   :  { %v397_v47 = vpop.f32.mrf.mxu0 }
 0x17c   :  { %v297_v60 = vmul.f32 %v397_v47, %v397_v47 }
 0x17d   :  { %v233_v51 = vpop.f32.mrf.mxu0 }
 0x17e   :  { %v296_v55 = vmul.f32 %v233_v51, %v233_v51 }
 0x180   :  { %v311_v58 = vadd.f32 %v310_v56, %v296_v55 }
 0x182   :  { %v312_v62 = vadd.f32 %v311_v58, %v297_v60 }
 0x183   :  { %v400_v53 = vpop.f32.mrf.mxu0 }
 0x184   :  { %v299_v1 = vmul.f32 %v400_v53, %v400_v53 }
 0x185   :  { %v243_v57 = vpop.f32.mrf.mxu0 }
 0x186   :  { %v298_v61 = vmul.f32 %v243_v57, %v243_v57 }
 0x188   :  { %v313_v0 = vadd.f32 %v312_v62, %v298_v61 }
 0x18a   :  { %v314_v4 = vadd.f32 %v313_v0, %v299_v1 }
 0x18b   :  { %v403_v59 = vpop.f32.mrf.mxu1 }
 0x18c   :  { %v301_v7 = vmul.f32 %v403_v59, %v403_v59 }
 0x18d   :  { %v253_v63 = vpop.f32.mrf.mxu1 }
 0x18e   :  { %v300_v2 = vmul.f32 %v253_v63, %v253_v63 }
 0x190   :  { %v315_v6 = vadd.f32 %v314_v4, %v300_v2 }
 0x192   :  { %v316_v9 = vadd.f32 %v315_v6, %v301_v7 }
 0x193   :  { %v406_v3 = vpop.f32.mrf.mxu1 }
 0x194   :  { %v303_v13 = vmul.f32 %v406_v3, %v406_v3 }
 0x195   :  { %v263_v5 = vpop.f32.mrf.mxu1 }
 0x196   :  { %v302_v8 = vmul.f32 %v263_v5, %v263_v5 }
 0x198   :  { %v317_v11 = vadd.f32 %v316_v9, %v302_v8 }
 0x19a   :  { %v318_v15 = vadd.f32 %v317_v11, %v303_v13 }
 0x19b   :  { %v409_v10 = vpop.f32.mrf.mxu1 }
 0x19c   :  { %v305_v18 = vmul.f32 %v409_v10, %v409_v10 }
 0x19d   :  { %v273_v12 = vpop.f32.mrf.mxu1 }
 0x19e   :  { %v304_v14 = vmul.f32 %v273_v12, %v273_v12 }
 0x1a0   :  { %v319_v16 = vadd.f32 %v318_v15, %v304_v14 }
 0x1a2   :  { %v320_v21 = vadd.f32 %v319_v16, %v305_v18 }
 0x1a3   :  { %v412_v17 = vpop.f32.mrf.mxu1 }
 0x1a4   :  { %v307_v22 = vmul.f32 %v412_v17, %v412_v17 }
 0x1a5   :  { %v283_v19 = vpop.f32.mrf.mxu1 }
 0x1a6   :  { %v306_v20 = vmul.f32 %v283_v19, %v283_v19 }
 0x1a8   :  { %v321_v23 = vadd.f32 %v320_v21, %v306_v20 }
 0x1aa   :  { %v322_v24 = vadd.f32 %v321_v23, %v307_v22 }
 0x1ac   :  { %323 = vadd.xlane.f32.xlu1 %v322_v24 }
 0x235   :  { %v324_v26 = vpop.xlane.xlu1 %323 }
 0x236   :  { %v325_v27 = vrot.slane %v324_v26, 4 }
 0x238   :  { %v326_v28 = vadd.f32 %v325_v27, %v324_v26 }
 0x23a   :  { %v327_v29 = vrot.slane %v326_v28, 2 }
 0x23c   :  { %v328_v30 = vadd.f32 %v327_v29, %v326_v28 }
 0x23e   :  { %v329_v31 = vrot.slane %v328_v30, 1 }
 0x240   :  { %v330_v32 = vadd.f32 %v329_v31, %v328_v30 }
 0x242   :  { %419 = vpush %v330_v32 }
 0x243   :  { %421 = vpush %v428_v33 }
 0x273   :  { %s420_s20 = spop %419 }
 0x274   :  { %s422_s21 = spop %421 }
 0x275   :  { %s336_s22 = smul.f32 %s422_s21, %s420_s20 }
 0x277   :  { %338 = sst [smem:[#allocation7]] %s336_s22 }
 0x278   :  { %346 = dma.smem_to_hbm %s485_s23, 16, %s528_s2, [#allocation4]  }
 0x279   :  { %481 = dma.done.wait [#allocation4], 16  }
 0x27a   :  { %482 = vsyncadd [#allocation4], 4294967280 }
 0x27b   :  { %350 = sfence }
 0x27c   :  { %351 = vsyncpa [#allocation3], 1 }
 0x27d   :  { %352 = vsyncpa [#allocation6], 1 }
 0x27e   :  { %353 = vsyncpa [#allocation4], 1 }

</bundles_post_ra>
